<compile_context>
chip_gen: v5e
topology: v5e:2x2
jax: 0.10.0
libtpu: 0.0.40
codegen_flags: <defaults>
</compile_context>

<pallas_src>
import jax
import jax.numpy as jnp
from jax import lax
from jax.experimental import pallas as pl
from jax.experimental.pallas import tpu as pltpu


def _round_up(x, m):
    return ((x + m - 1) // m) * m


def _vmem_limit_bytes():
    # Per-generation VMEM budget: ~100 MiB on v5e/v6e (128 MiB physical),
    # capacity-minus-headroom (~56 MiB) on v7x (64 MiB physical).
    try:
        cap = int(pltpu.get_tpu_info().vmem_capacity_bytes)
    except Exception:
        cap = 64 * 1024 * 1024
    return max(32 * 1024 * 1024, min(cap - 8 * 1024 * 1024, 100 * 1024 * 1024))


# ----------------------- generic K-tiled matmul kernels -----------------------
def _mm_kernel(a_ref, b_ref, o_ref, acc_ref):
    """One (TM, TK) x (TK, Dp) step; f32 accumulation in VMEM scratch."""
    @pl.when(pl.program_id(1) == 0)
    def _init():
        acc_ref[...] = jnp.zeros_like(acc_ref)

    a = a_ref[...].astype(jnp.bfloat16)          # no-op for bf16; int8 adj -> bf16
    acc_ref[...] += jnp.dot(a, b_ref[...], preferred_element_type=jnp.float32)

    @pl.when(pl.program_id(1) == pl.num_programs(1) - 1)
    def _store():
        o_ref[...] = acc_ref[...].astype(o_ref.dtype)


def _mm_stats_kernel(a_ref, b_ref, o_ref, csum_ref, csq_ref, acc_ref):
    """Same as _mm_kernel, but also emits per-row-tile column sums / sums of
    squares (taken from the f32 accumulator before the bf16 downcast) so
    batch-norm statistics stay global under row tiling."""
    @pl.when(pl.program_id(1) == 0)
    def _init():
        acc_ref[...] = jnp.zeros_like(acc_ref)

    a = a_ref[...].astype(jnp.bfloat16)
    acc_ref[...] += jnp.dot(a, b_ref[...], preferred_element_type=jnp.float32)

    @pl.when(pl.program_id(1) == pl.num_programs(1) - 1)
    def _store():
        acc = acc_ref[...]
        o_ref[...] = acc.astype(o_ref.dtype)
        # Sublane/lane-dense (8, Dp) unmasked stores: replicate the per-tile
        # column sums over 8 sublanes, pre-scaled by 1/8 so the host-side
        # reduction is a plain sum over all rows.
        csum = jnp.sum(acc, axis=0, keepdims=True) * 0.125
        csq = jnp.sum(acc * acc, axis=0, keepdims=True) * 0.125
        csum_ref[...] = jnp.broadcast_to(csum, csum_ref.shape)
        csq_ref[...] = jnp.broadcast_to(csq, csq_ref.shape)


# ------------------------- folded batch-norm + ELU ----------------------------
def _bn_elu_kernel(x_ref, scale_ref, bias_ref, o_ref):
    """y = x*scale + bias (folded BN), then ELU.  Lane-dense elementwise pass."""
    y = x_ref[...].astype(jnp.float32) * scale_ref[...] + bias_ref[...]
    o_ref[...] = jnp.where(y > 0, y, jnp.exp(jnp.minimum(y, 0.0)) - 1.0).astype(o_ref.dtype)


# ------------------------------ matmul wrapper --------------------------------
def _matmul(a, b, *, emit_stats, vmem_limit, out_dtype=jnp.bfloat16):
    """C = A @ B on the MXU.  A may be int8 (cast in-kernel); B must be bf16.
    Row-tiled ("parallel") and K-tiled ("arbitrary") with an f32 accumulator.
    Returns padded C of shape (Mp, Dp); with emit_stats also (nm*8, Dp) f32
    column sums / sums-of-squares of C."""
    M, K = a.shape
    K2, D = b.shape
    assert K == K2, (a.shape, b.shape)

    TM = min(256, _round_up(M, 8))   # 256 rows fills the 256-wide MXU (v6e/v7x)
    Mp = _round_up(M, TM)
    Dp = _round_up(D, 128)           # lane-dense, unmasked output stores
    if K > 256:
        TK = 256                     # bound VMEM independent of graph size
        Kp = _round_up(K, TK)
    else:
        TK = Kp = K                  # single K step; block == full K extent
    nm, nk = Mp // TM, Kp // TK

    a_p = jnp.pad(a, ((0, Mp - M), (0, Kp - K)))
    b_p = jnp.pad(b, ((0, Kp - K), (0, Dp - D)))

    cp = pltpu.CompilerParams(
        dimension_semantics=("parallel", "arbitrary"),
        vmem_limit_bytes=vmem_limit,
    )
    in_specs = [
        pl.BlockSpec((TM, TK), lambda i, k: (i, k)),
        # TODO(synk): when nk == 1 this block is grid-invariant; pipeline_mode=
        #             pl.Buffered(1) would halve its VMEM footprint.
        pl.BlockSpec((TK, Dp), lambda i, k: (k, 0)),
    ]
    scratch = [pltpu.VMEM((TM, Dp), jnp.float32)]

    if not emit_stats:
        return pl.pallas_call(
            _mm_kernel,
            out_shape=jax.ShapeDtypeStruct((Mp, Dp), out_dtype),
            grid=(nm, nk),
            in_specs=in_specs,
            out_specs=pl.BlockSpec((TM, Dp), lambda i, k: (i, 0)),
            scratch_shapes=scratch,
            compiler_params=cp,
        )(a_p, b_p)

    return pl.pallas_call(
        _mm_stats_kernel,
        out_shape=(jax.ShapeDtypeStruct((Mp, Dp), out_dtype),
                   jax.ShapeDtypeStruct((nm * 8, Dp), jnp.float32),
                   jax.ShapeDtypeStruct((nm * 8, Dp), jnp.float32)),
        grid=(nm, nk),
        in_specs=in_specs,
        out_specs=(pl.BlockSpec((TM, Dp), lambda i, k: (i, 0)),
                   pl.BlockSpec((8, Dp), lambda i, k: (i, 0)),
                   pl.BlockSpec((8, Dp), lambda i, k: (i, 0))),
        scratch_shapes=scratch,
        compiler_params=cp,
    )(a_p, b_p)


# --------------------------------- wrapper -------------------------------------
def pack_adjacency(adj):
    """Binarize (edge present iff adj[dst, src] != 0), pad rows/cols to the
    row-tile multiple and ship as int8.  Call ONCE per graph and cache: doing
    this every forward costs an extra O(N^2) HBM pass.  Edge weights are
    intentionally discarded -- the isotropic reduce is an unweighted sum."""
    N = adj.shape[0]
    TM = min(256, _round_up(N, 8))
    Np = _round_up(N, TM)
    a = (adj != 0).astype(jnp.int8)
    return jnp.pad(a, ((0, Np - N), (0, Np - N)))


def _bn_row_tile(np_rows, dp):
    # HBM-bound elementwise pass: big row tiles (up to 2048) to approach the HBM
    # roofline, bounded by a VMEM budget (bf16 in + f32 out, double buffered).
    cap = max(256, (8 * 1024 * 1024) // (12 * dp))
    if np_rows <= cap:
        return np_rows
    for cand in (2048, 1024, 512, 256):
        if cand <= cap and np_rows % cand == 0:
            return cand
    return min(np_rows, 256)


def gat_isotropic_forward(h, adj_packed, params, *, batch_norm=True, eps=1e-5):
    """Forward of CustomGATHeadLayerIsotropic.

    h          : (N, in_dim) node features.
    adj_packed : (Np, Np) int8 from pack_adjacency(); adj[dst, src]=1 iff edge src->dst.
    params     : {"W": (in_dim, out_dim)  (== torch fc.weight.T, no bias),
                  "gamma"/"beta": (out_dim,) BatchNorm1d affine parameters}
    """
    N, in_dim = h.shape
    Np = adj_packed.shape[0]
    out_dim = params["W"].shape[1]

    vmem_limit = _vmem_limit_bytes()

    # bf16 MXU operands built in the wrapper (half the HBM read traffic of f32;
    # accumulation stays f32 inside the kernels).
    h_b = jnp.pad(h.astype(jnp.bfloat16), ((0, Np - N), (0, 0)))
    W_b = params["W"].astype(jnp.bfloat16)

    if out_dim <= in_dim:
        # Project first: the O(N^2) adjacency matmul runs at width out_dim.
        z = _matmul(h_b, W_b, emit_stats=False, vmem_limit=vmem_limit)            # (Np, Dp)
        agg, csum, csq = _matmul(adj_packed, z, emit_stats=True, vmem_limit=vmem_limit)
    else:
        # Aggregate first: the O(N^2) adjacency matmul runs at width in_dim.
        Dp_in = _round_up(in_dim, 128)
        h_lane = jnp.pad(h_b, ((0, 0), (0, Dp_in - in_dim)))
        hz = _matmul(adj_packed, h_lane, emit_stats=False, vmem_limit=vmem_limit)  # (Np, Dp_in)
        W_rows = jnp.pad(W_b, ((0, Dp_in - in_dim), (0, 0)))
        agg, csum, csq = _matmul(hz, W_rows, emit_stats=True, vmem_limit=vmem_limit)

    Dp = agg.shape[1]

    # Global BN statistics (tiny O(n_tiles*8*Dp) reduction), folded into one
    # scale/bias pair so the elementwise kernel streams 2 vectors instead of 4.
    if batch_norm:
        mean = jnp.sum(csum, axis=0) / N
        var = jnp.maximum(jnp.sum(csq, axis=0) / N - mean * mean, 0.0)
        rstd = lax.rsqrt(var + eps)
        gamma = jnp.pad(params["gamma"].astype(jnp.float32), (0, Dp - out_dim))
        beta = jnp.pad(params["beta"].astype(jnp.float32), (0, Dp - out_dim))
        scale = gamma * rstd
        bias = beta - mean * scale
    else:
        scale = jnp.ones((Dp,), jnp.float32)
        bias = jnp.zeros((Dp,), jnp.float32)
    scale = scale.reshape(1, Dp)
    bias = bias.reshape(1, Dp)

    TB = _bn_row_tile(Np, Dp)
    out_p = pl.pallas_call(
        _bn_elu_kernel,
        out_shape=jax.ShapeDtypeStruct((Np, Dp), jnp.float32),
        grid=(Np // TB,),
        in_specs=[pl.BlockSpec((TB, Dp), lambda i: (i, 0)),
                  pl.BlockSpec((1, Dp), lambda i: (0, 0)),
                  pl.BlockSpec((1, Dp), lambda i: (0, 0))],
        out_specs=pl.BlockSpec((TB, Dp), lambda i: (i, 0)),
        compiler_params=pltpu.CompilerParams(
            dimension_semantics=("parallel",),
            vmem_limit_bytes=vmem_limit,
        ),
    )(agg, scale, bias)

    return out_p[:N, :out_dim]


# --------------------------------- demo / check --------------------------------
def _reference(h, adj, params, eps=1e-5, batch_norm=True):
    z = h @ params["W"]
    agg = (adj != 0).astype(jnp.float32) @ z
    if batch_norm:
        mu = agg.mean(axis=0, keepdims=True)
        var = ((agg - mu) ** 2).mean(axis=0, keepdims=True)
        agg = (agg - mu) * lax.rsqrt(var + eps) * params["gamma"] + params["beta"]
    return jnp.where(agg > 0, agg, jnp.exp(jnp.minimum(agg, 0.0)) - 1.0)


if __name__ == "__main__":
    def run_case(key, N, in_dim, out_dim):
        k_h, k_w, k_adj, k_g, k_b = jax.random.split(key, 5)
        h = jax.random.normal(k_h, (N, in_dim), dtype=jnp.float32)
        params = {
            "W": jax.random.normal(k_w, (in_dim, out_dim), dtype=jnp.float32)
                 * (1.0 / jnp.sqrt(in_dim)),
            "gamma": 1.0 + 0.1 * jax.random.normal(k_g, (out_dim,), dtype=jnp.float32),
            "beta": 0.1 * jax.random.normal(k_b, (out_dim,), dtype=jnp.float32),
        }
        # Random sparse-ish graph with self loops, stored dense: adj[dst, src].
        adj = (jax.random.uniform(k_adj, (N, N)) < 0.15).astype(jnp.float32)
        adj = jnp.maximum(adj, jnp.eye(N, dtype=jnp.float32))

        adj_packed = pack_adjacency(adj)          # precompute / cache per graph
        out = gat_isotropic_forward(h, adj_packed, params, batch_norm=True)
        jax.block_until_ready(out)

        ref = _reference(h, adj, params)
        assert out.shape == (N, out_dim), out.shape
        assert bool(jnp.all(jnp.isfinite(out)))
        err = float(jnp.max(jnp.abs(out - ref)))
        assert bool(jnp.allclose(out, ref, rtol=1e-1, atol=1e-1)), err

    key = jax.random.PRNGKey(0)
    k1, k2 = jax.random.split(key)
    run_case(k1, N=32, in_dim=16, out_dim=8)    # project-first path (out_dim <= in_dim)
    run_case(k2, N=24, in_dim=8, out_dim=20)    # aggregate-first path (in_dim < out_dim)
    print("KERNEL_OK")
</pallas_src>

<mosaic_0001>
module attributes {stable_mosaic.version = 11 : i64} {
  func.func @_mm_kernel(%arg0: i32, %arg1: i32, %arg2: memref<32x16xbf16, #tpu.memory_space<vmem>>, %arg3: memref<16x128xbf16, #tpu.memory_space<vmem>>, %arg4: memref<32x128xbf16, #tpu.memory_space<vmem>>, %arg5: memref<32x128xf32, #tpu.memory_space<vmem>>) attributes {dimension_semantics = [#tpu.dimension_semantics<parallel>, #tpu.dimension_semantics<arbitrary>], iteration_bounds = array<i64: 1, 1>, scalar_prefetch = 0 : i64, scratch_operands = 1 : i64, tpu.core_type = #tpu.core_type<tc>, window_params = [{transform_indices = @transform_0, window_bounds = array<i64: 32, 16>}, {transform_indices = @transform_1, window_bounds = array<i64: 16, 128>}, {transform_indices = @transform_2, window_bounds = array<i64: 32, 128>}]} {
    %c0_i32 = arith.constant 0 : i32
    %0 = arith.cmpi eq, %arg1, %c0_i32 : i32
    %1 = arith.extui %0 : i1 to i32
    %c0_i32_0 = arith.constant 0 : i32
    %2 = arith.cmpi ne, %1, %c0_i32_0 : i32
    scf.if %2 {
      %cst_10 = arith.constant 0.000000e+00 : f32
      %12 = vector.broadcast %cst_10 : f32 to vector<32x128xf32>
      %c0_11 = arith.constant 0 : index
      %c0_12 = arith.constant 0 : index
      %13 = vector.load %arg5[%c0_11, %c0_12] : memref<32x128xf32, #tpu.memory_space<vmem>>, vector<32x128xf32>
      tpu.vector_store %arg5[%c0_11, %c0_12], %12 {strides = array<i32>} : memref<32x128xf32, #tpu.memory_space<vmem>>, vector<32x128xf32>,
    } else {
    }
    %c0 = arith.constant 0 : index
    %c0_1 = arith.constant 0 : index
    %3 = vector.load %arg2[%c0, %c0_1] : memref<32x16xbf16, #tpu.memory_space<vmem>>, vector<32x16xbf16>
    %c0_2 = arith.constant 0 : index
    %c0_3 = arith.constant 0 : index
    %4 = vector.load %arg5[%c0_2, %c0_3] : memref<32x128xf32, #tpu.memory_space<vmem>>, vector<32x128xf32>
    %c0_4 = arith.constant 0 : index
    %c0_5 = arith.constant 0 : index
    %5 = vector.load %arg3[%c0_4, %c0_5] : memref<16x128xbf16, #tpu.memory_space<vmem>>, vector<16x128xbf16>
    %cst = arith.constant dense<0.000000e+00> : vector<32x128xf32>
    %6 = tpu.matmul %3, %5, %cst {dimension_numbers = #tpu.dot_dimension_numbers<[1], [0], [0], [1], [0, 0, 1, 1], [], []>} : vector<32x16xbf16>, vector<16x128xbf16>, vector<32x128xf32> -> vector<32x128xf32>
    %7 = arith.addf %4, %6 : vector<32x128xf32>
    %c0_6 = arith.constant 0 : index
    %c0_7 = arith.constant 0 : index
    %8 = vector.load %arg5[%c0_6, %c0_7] : memref<32x128xf32, #tpu.memory_space<vmem>>, vector<32x128xf32>
    tpu.vector_store %arg5[%c0_6, %c0_7], %7 {strides = array<i32>} : memref<32x128xf32, #tpu.memory_space<vmem>>, vector<32x128xf32>,
    %c0_i32_8 = arith.constant 0 : i32
    %9 = arith.cmpi eq, %arg1, %c0_i32_8 : i32
    %10 = arith.extui %9 : i1 to i32
    %c0_i32_9 = arith.constant 0 : i32
    %11 = arith.cmpi ne, %10, %c0_i32_9 : i32
    scf.if %11 {
      %c0_10 = arith.constant 0 : index
      %c0_11 = arith.constant 0 : index
      %12 = vector.load %arg5[%c0_10, %c0_11] : memref<32x128xf32, #tpu.memory_space<vmem>>, vector<32x128xf32>
      %13 = arith.truncf %12 : vector<32x128xf32> to vector<32x128xbf16>
      %c0_12 = arith.constant 0 : index
      %c0_13 = arith.constant 0 : index
      %14 = vector.load %arg4[%c0_12, %c0_13] : memref<32x128xbf16, #tpu.memory_space<vmem>>, vector<32x128xbf16>
      tpu.vector_store %arg4[%c0_12, %c0_13], %13 {strides = array<i32>} : memref<32x128xbf16, #tpu.memory_space<vmem>>, vector<32x128xbf16>,
    } else {
    }
    return
  }
  func.func @transform_0(%arg0: i32, %arg1: i32) -> (i32, i32) {
    %c0_i32 = arith.constant 0 : i32
    return %arg0, %arg1 : i32, i32
  }
  func.func @transform_1(%arg0: i32, %arg1: i32) -> (i32, i32) {
    %c0_i32 = arith.constant 0 : i32
    %c0_i32_0 = arith.constant 0 : i32
    return %arg1, %c0_i32 : i32, i32
  }
  func.func @transform_2(%arg0: i32, %arg1: i32) -> (i32, i32) {
    %c0_i32 = arith.constant 0 : i32
    %c0_i32_0 = arith.constant 0 : i32
    return %arg0, %c0_i32 : i32, i32
  }
}

</mosaic_0001>

<bundles_post_ra>
// kernel: tpu_custom_call.1
= control target key start
LH: loop header
LB: loop body
LE: loop exit
PB: predicated region body
PF: predicated region fallthrough
CT: control target
= control target key end

     0   :  { %s202_s0 = inlined_call_operand.vmem [shape: bf16[32,16], index: 0, kind: input, shape index: {}]   ;;  %s203_s1 = inlined_call_operand.vmem [shape: bf16[16,128], index: 1, kind: input, shape index: {}]   ;;  %s204_s2 = inlined_call_operand.hbm [shape: bf16[32,128], index: 2, kind: output, shape index: {}]  }
   0x1   :  { %v130_v0 = vld [vmem:[%s203_s1] sm:$0xff]  ;;  %v129_v2 = vld [vmem:[%s202_s0 + $0x8] sm:$0xff] }
   0x2   :  { %v128_v1 = vld [vmem:[%s202_s0] sm:$0xff] }
   0x3   :  { %7 = vsyncpa [#allocation4], 0  ;;  %61 = vmatpush.bf16.msra.mxu0 %v130_v0  ;;  %142 = vmatpush.bf16.msra.mxu1 %v130_v0  ;;  %vm47_vm0 = vcmask 130048   ;;  %s172_s15 = smov [#allocation3]   ;;  %s102_s18 = sshll.u32 %s204_s2, 4  ;;  %s103_s18 = int_to_ptr.hbm [resolvable:$true] %s102_s18 }
   0x4   :  { %s100_s16 = sshll.u32 %s172_s15, 4  ;;  %s173_s0 = smov 64   ;;  %s101_s16 = int_to_ptr.vmem [resolvable:$true] %s100_s16 }
   0x5   :  { %s174_s19 = smov 4  }
   0x6   :  { %126 = vmatmul.msk.bf16.vlgmr.msra.gmra.mxu0 %vm47_vm0, %v128_v1  ;;  %127 = vmatmul.msk.bf16.vlgmr.msra.gmra.mxu1 %vm47_vm0, %v129_v2 }
  0x83   :  { %v63_v3 = vpop.f32.mrf.mxu0  ;;  %v68_v4 = vpop.f32.mrf.mxu1 }
  0x8b   :  { %v65_v5 = vpop.f32.mrf.mxu0  ;;  %v70_v6 = vpop.f32.mrf.mxu1 }
  0x8c   :  { %v134_v7 = vpack.c.bf16 %v65_v5, %v63_v3  ;;  %v139_v8 = vpack.c.bf16 %v70_v6, %v68_v4 }
  0x8e   :  { %135 = vst [vmem:[#allocation3] sm:$0xff] %v134_v7  }
  0x8f   :  { %141 = vst [vmem:[#allocation3 + $0x8] sm:$0xff] %v139_v8  }
  0x90   :  { %108 = dma.vmem_to_hbm [thread:$0]  %s101_s16, 256, %s103_s18, [#allocation4], %s173_s0, %s173_s0, %s174_s19  }
  0x91   :  { %170 = dma.done.wait [#allocation4], 256  }
  0x92   :  { %171 = vsyncadd [#allocation4], 4294967040 }
  0x93   :  { %113 = vsyncpa [#allocation4], 1 }

</bundles_post_ra>
